<compile_context>
chip_gen: v7x
topology: tpu7x:2x2x1
jax: 0.10.0
libtpu: 0.0.40
codegen_flags: <defaults>
</compile_context>

<pallas_src>
import jax
import jax.numpy as jnp
from jax import lax
from jax.experimental import pallas as pl
from jax.experimental.pallas import tpu as pltpu


def lstm_fc_relu_kernel(x_ref, wih_ref, whh_ref, b_ref, wfc_ref, bfc_ref,
                        o_ref, pre_ref):
    """Whole forward pass in one invocation.

    x_ref  : (S*B, IN)  time-major flattened input (row t*B+b = timestep t, batch b)
    wih_ref: (IN, 4H)   gate columns reordered to (i, f, o, g)
    whh_ref: (H, 4H)    gate columns reordered to (i, f, o, g)
    b_ref  : (1, 4H)    b_ih + b_hh, reordered
    wfc_ref: (H, OUT), bfc_ref: (1, OUT)
    o_ref  : (B, OUT)
    pre_ref: VMEM scratch (S*B, 4H) holding the hoisted input projection.
    """
    sb = x_ref.shape[0]
    hid = whh_ref.shape[0]
    h4 = 4 * hid
    batch = o_ref.shape[0]
    seq = sb // batch

    # Phase 1: one large MXU matmul for ALL timesteps + fused bias.
    pre_ref[...] = (
        jnp.dot(x_ref[...], wih_ref[...], preferred_element_type=jnp.float32)
        + b_ref[...])

    whh = whh_ref[...]
    lane = lax.broadcasted_iota(jnp.int32, (batch, h4), 1)
    tanh_mask = lane >= 3 * hid          # columns [3H:4H) hold the g gate

    # Phase 2: serial recurrence; only h_prev @ W_hh^T remains on the critical path.
    def step(t, carry):
        h_prev, c_prev = carry
        pre_t = pre_ref[pl.ds(t * batch, batch), :]                 # (B, 4H)
        gates = pre_t + jnp.dot(h_prev, whh,
                                preferred_element_type=jnp.float32)
        # Full-vreg EUP passes; the tanh (g) block is selected with a lane mask.
        act = jnp.where(tanh_mask, jnp.tanh(gates), jax.nn.sigmoid(gates))
        i_g = act[:, 0 * hid:1 * hid]
        f_g = act[:, 1 * hid:2 * hid]
        o_g = act[:, 2 * hid:3 * hid]
        g_g = act[:, 3 * hid:4 * hid]
        c_new = f_g * c_prev + i_g * g_g
        h_new = o_g * jnp.tanh(c_new)
        return h_new, c_new

    h0 = jnp.zeros((batch, hid), jnp.float32)
    c0 = jnp.zeros((batch, hid), jnp.float32)
    h_last, _ = lax.fori_loop(0, seq, step, (h0, c0), unroll=True)

    # Phase 3: nn.Linear on the last timestep's hidden state, then ReLU.
    y = jnp.dot(h_last, wfc_ref[...], preferred_element_type=jnp.float32) \
        + bfc_ref[...]
    o_ref[...] = jnp.maximum(y, 0.0).astype(o_ref.dtype)


def my_sequential_forward(x, params):
    """x: (B, S, IN) float32 (batch_first).  Returns (B, OUT) float32."""
    B, S, IN = x.shape
    w_ih, w_hh, b_ih, b_hh, w_fc, b_fc = params
    H = w_hh.shape[1]
    OUT = w_fc.shape[0]

    def reorder_gates(a):
        # last-axis gate blocks (i, f, g, o) -> (i, f, o, g)
        return jnp.concatenate(
            [a[..., :2 * H], a[..., 3 * H:4 * H], a[..., 2 * H:3 * H]], axis=-1)

    # Host-side (plain XLA) weight prep: transpose for (B,K)@(K,N) MXU matmuls,
    # reorder gate columns, fuse the two LSTM biases.
    w_ih_t = reorder_gates(jnp.transpose(w_ih))            # (IN, 4H)
    w_hh_t = reorder_gates(jnp.transpose(w_hh))            # (H, 4H)
    b_comb = reorder_gates(b_ih + b_hh).reshape(1, 4 * H)  # (1, 4H)
    w_fc_t = jnp.transpose(w_fc)                           # (H, OUT)
    b_fc_2d = b_fc.reshape(1, OUT)

    # Time-major flatten so timestep t occupies rows [t*B, (t+1)*B).
    x_sb = jnp.transpose(x, (1, 0, 2)).reshape(S * B, IN)

    return pl.pallas_call(
        lstm_fc_relu_kernel,
        out_shape=jax.ShapeDtypeStruct((B, OUT), jnp.float32),
        in_specs=[pl.BlockSpec(memory_space=pltpu.MemorySpace.VMEM)] * 6,
        out_specs=pl.BlockSpec(memory_space=pltpu.MemorySpace.VMEM),
        scratch_shapes=[pltpu.VMEM((S * B, 4 * H), jnp.float32)],
    )(x_sb, w_ih_t, w_hh_t, b_comb, w_fc_t, b_fc_2d)


def reference_forward(x, params):
    """Pure-JAX reference matching PyTorch LSTM -> last step -> Linear -> ReLU."""
    w_ih, w_hh, b_ih, b_hh, w_fc, b_fc = params
    B, S, IN = x.shape
    H = w_hh.shape[1]
    h = jnp.zeros((B, H), jnp.float32)
    c = jnp.zeros((B, H), jnp.float32)
    for t in range(S):
        gates = x[:, t, :] @ w_ih.T + b_ih + h @ w_hh.T + b_hh
        i = jax.nn.sigmoid(gates[:, 0 * H:1 * H])
        f = jax.nn.sigmoid(gates[:, 1 * H:2 * H])
        g = jnp.tanh(gates[:, 2 * H:3 * H])
        o = jax.nn.sigmoid(gates[:, 3 * H:4 * H])
        c = f * c + i * g
        h = o * jnp.tanh(c)
    y = h @ w_fc.T + b_fc
    return jnp.maximum(y, 0.0)


if __name__ == "__main__":
    B, S, IN, HID, OUT = 2, 8, 32, 32, 16

    key = jax.random.PRNGKey(0)
    ks = jax.random.split(key, 7)
    scale = 0.1
    x = jax.random.normal(ks[0], (B, S, IN), jnp.float32)
    w_ih = scale * jax.random.normal(ks[1], (4 * HID, IN), jnp.float32)
    w_hh = scale * jax.random.normal(ks[2], (4 * HID, HID), jnp.float32)
    b_ih = scale * jax.random.normal(ks[3], (4 * HID,), jnp.float32)
    b_hh = scale * jax.random.normal(ks[4], (4 * HID,), jnp.float32)
    w_fc = scale * jax.random.normal(ks[5], (OUT, HID), jnp.float32)
    b_fc = scale * jax.random.normal(ks[6], (OUT,), jnp.float32)
    params = (w_ih, w_hh, b_ih, b_hh, w_fc, b_fc)

    out = my_sequential_forward(x, params)
    out = jax.block_until_ready(out)

    ref = reference_forward(x, params)
    assert out.shape == (B, OUT)
    assert jnp.allclose(out, ref, atol=1e-4, rtol=1e-4), "mismatch vs reference"

    print("KERNEL_OK")
</pallas_src>

<mosaic_0001>
module attributes {stable_mosaic.version = 11 : i64} {
  func.func @lstm_fc_relu_kernel(%arg0: memref<16x32xf32, #tpu.memory_space<vmem>>, %arg1: memref<32x128xf32, #tpu.memory_space<vmem>>, %arg2: memref<32x128xf32, #tpu.memory_space<vmem>>, %arg3: memref<1x128xf32, #tpu.memory_space<vmem>>, %arg4: memref<32x16xf32, #tpu.memory_space<vmem>>, %arg5: memref<1x16xf32, #tpu.memory_space<vmem>>, %arg6: memref<2x16xf32, #tpu.memory_space<vmem>>, %arg7: memref<16x128xf32, #tpu.memory_space<vmem>>) attributes {dimension_semantics = [], scalar_prefetch = 0 : i64, scratch_operands = 1 : i64, tpu.core_type = #tpu.core_type<tc>} {
    %c0 = arith.constant 0 : index
    %c0_0 = arith.constant 0 : index
    %0 = vector.load %arg0[%c0, %c0_0] : memref<16x32xf32, #tpu.memory_space<vmem>>, vector<16x32xf32>
    %c0_1 = arith.constant 0 : index
    %c0_2 = arith.constant 0 : index
    %1 = vector.load %arg1[%c0_1, %c0_2] : memref<32x128xf32, #tpu.memory_space<vmem>>, vector<32x128xf32>
    %cst = arith.constant dense<0.000000e+00> : vector<16x128xf32>
    %2 = tpu.matmul %0, %1, %cst {dimension_numbers = #tpu.dot_dimension_numbers<[1], [0], [0], [1], [0, 0, 1, 1], [], []>} : vector<16x32xf32>, vector<32x128xf32>, vector<16x128xf32> -> vector<16x128xf32>
    %c0_3 = arith.constant 0 : index
    %c0_4 = arith.constant 0 : index
    %3 = vector.load %arg3[%c0_3, %c0_4] : memref<1x128xf32, #tpu.memory_space<vmem>>, vector<1x128xf32>
    %4 = vector.broadcast %3 : vector<1x128xf32> to vector<16x128xf32>
    %5 = arith.addf %2, %4 : vector<16x128xf32>
    %c0_5 = arith.constant 0 : index
    %c0_6 = arith.constant 0 : index
    %6 = vector.load %arg7[%c0_5, %c0_6] : memref<16x128xf32, #tpu.memory_space<vmem>>, vector<16x128xf32>
    tpu.vector_store %arg7[%c0_5, %c0_6], %5 {strides = array<i32>} : memref<16x128xf32, #tpu.memory_space<vmem>>, vector<16x128xf32>,
    %c0_7 = arith.constant 0 : index
    %c0_8 = arith.constant 0 : index
    %7 = vector.load %arg2[%c0_7, %c0_8] : memref<32x128xf32, #tpu.memory_space<vmem>>, vector<32x128xf32>
    %8 = tpu.iota {dimensions = array<i32: 1>} : vector<2x128xi32>
    %c96_i32 = arith.constant 96 : i32
    %9 = vector.broadcast %c96_i32 : i32 to vector<2x128xi32>
    %10 = arith.cmpi sge, %8, %9 : vector<2x128xi32>
    %cst_9 = arith.constant 0.000000e+00 : f32
    %11 = vector.broadcast %cst_9 : f32 to vector<2x32xf32>
    %cst_10 = arith.constant 0.000000e+00 : f32
    %12 = vector.broadcast %cst_10 : f32 to vector<2x32xf32>
    %c0_i32 = arith.constant 0 : i32
    %c2_i32 = arith.constant 2 : i32
    %13 = arith.muli %c0_i32, %c2_i32 : i32
    %14 = arith.index_cast %13 : i32 to index
    %c0_11 = arith.constant 0 : index
    %15 = vector.load %arg7[%14, %c0_11] : memref<16x128xf32, #tpu.memory_space<vmem>>, vector<2x128xf32>
    %cst_12 = arith.constant dense<0.000000e+00> : vector<2x128xf32>
    %16 = tpu.matmul %11, %7, %cst_12 {dimension_numbers = #tpu.dot_dimension_numbers<[1], [0], [0], [1], [0, 0, 1, 1], [], []>} : vector<2x32xf32>, vector<32x128xf32>, vector<2x128xf32> -> vector<2x128xf32>
    %17 = arith.addf %15, %16 : vector<2x128xf32>
    %18 = math.tanh %17 : vector<2x128xf32>
    %19 = arith.negf %17 : vector<2x128xf32>
    %20 = math.exp %19 : vector<2x128xf32>
    %cst_13 = arith.constant 1.000000e+00 : f32
    %21 = vector.broadcast %cst_13 : f32 to vector<2x128xf32>
    %22 = arith.addf %21, %20 : vector<2x128xf32>
    %23 = arith.divf %21, %22 : vector<2x128xf32>
    %24 = arith.select %10, %18, %23 : vector<2x128xi1>, vector<2x128xf32>
    %25 = vector.extract_strided_slice %24 {offsets = [0, 0], sizes = [2, 32], strides = [1, 1]} : vector<2x128xf32> to vector<2x32xf32>
    %26 = vector.extract_strided_slice %24 {offsets = [0, 32], sizes = [2, 32], strides = [1, 1]} : vector<2x128xf32> to vector<2x32xf32>
    %27 = vector.extract_strided_slice %24 {offsets = [0, 64], sizes = [2, 32], strides = [1, 1]} : vector<2x128xf32> to vector<2x32xf32>
    %28 = vector.extract_strided_slice %24 {offsets = [0, 96], sizes = [2, 32], strides = [1, 1]} : vector<2x128xf32> to vector<2x32xf32>
    %29 = arith.mulf %26, %12 : vector<2x32xf32>
    %30 = arith.mulf %25, %28 : vector<2x32xf32>
    %31 = arith.addf %29, %30 : vector<2x32xf32>
    %32 = math.tanh %31 : vector<2x32xf32>
    %33 = arith.mulf %27, %32 : vector<2x32xf32>
    %c1_i32 = arith.constant 1 : i32
    %c2_i32_14 = arith.constant 2 : i32
    %34 = arith.muli %c1_i32, %c2_i32_14 : i32
    %35 = arith.index_cast %34 : i32 to index
    %c0_15 = arith.constant 0 : index
    %36 = vector.load %arg7[%35, %c0_15] : memref<16x128xf32, #tpu.memory_space<vmem>>, vector<2x128xf32>
    %cst_16 = arith.constant dense<0.000000e+00> : vector<2x128xf32>
    %37 = tpu.matmul %33, %7, %cst_16 {dimension_numbers = #tpu.dot_dimension_numbers<[1], [0], [0], [1], [0, 0, 1, 1], [], []>} : vector<2x32xf32>, vector<32x128xf32>, vector<2x128xf32> -> vector<2x128xf32>
    %38 = arith.addf %36, %37 : vector<2x128xf32>
    %39 = math.tanh %38 : vector<2x128xf32>
    %40 = arith.negf %38 : vector<2x128xf32>
    %41 = math.exp %40 : vector<2x128xf32>
    %cst_17 = arith.constant 1.000000e+00 : f32
    %42 = vector.broadcast %cst_17 : f32 to vector<2x128xf32>
    %43 = arith.addf %42, %41 : vector<2x128xf32>
    %44 = arith.divf %42, %43 : vector<2x128xf32>
    %45 = arith.select %10, %39, %44 : vector<2x128xi1>, vector<2x128xf32>
    %46 = vector.extract_strided_slice %45 {offsets = [0, 0], sizes = [2, 32], strides = [1, 1]} : vector<2x128xf32> to vector<2x32xf32>
    %47 = vector.extract_strided_slice %45 {offsets = [0, 32], sizes = [2, 32], strides = [1, 1]} : vector<2x128xf32> to vector<2x32xf32>
    %48 = vector.extract_strided_slice %45 {offsets = [0, 64], sizes = [2, 32], strides = [1, 1]} : vector<2x128xf32> to vector<2x32xf32>
    %49 = vector.extract_strided_slice %45 {offsets = [0, 96], sizes = [2, 32], strides = [1, 1]} : vector<2x128xf32> to vector<2x32xf32>
    %50 = arith.mulf %47, %31 : vector<2x32xf32>
    %51 = arith.mulf %46, %49 : vector<2x32xf32>
    %52 = arith.addf %50, %51 : vector<2x32xf32>
    %53 = math.tanh %52 : vector<2x32xf32>
    %54 = arith.mulf %48, %53 : vector<2x32xf32>
    %c2_i32_18 = arith.constant 2 : i32
    %c2_i32_19 = arith.constant 2 : i32
    %55 = arith.muli %c2_i32_18, %c2_i32_19 : i32
    %56 = arith.index_cast %55 : i32 to index
    %c0_20 = arith.constant 0 : index
    %57 = vector.load %arg7[%56, %c0_20] : memref<16x128xf32, #tpu.memory_space<vmem>>, vector<2x128xf32>
    %cst_21 = arith.constant dense<0.000000e+00> : vector<2x128xf32>
    %58 = tpu.matmul %54, %7, %cst_21 {dimension_numbers = #tpu.dot_dimension_numbers<[1], [0], [0], [1], [0, 0, 1, 1], [], []>} : vector<2x32xf32>, vector<32x128xf32>, vector<2x128xf32> -> vector<2x128xf32>
    %59 = arith.addf %57, %58 : vector<2x128xf32>
    %60 = math.tanh %59 : vector<2x128xf32>
    %61 = arith.negf %59 : vector<2x128xf32>
    %62 = math.exp %61 : vector<2x128xf32>
    %cst_22 = arith.constant 1.000000e+00 : f32
    %63 = vector.broadcast %cst_22 : f32 to vector<2x128xf32>
    %64 = arith.addf %63, %62 : vector<2x128xf32>
    %65 = arith.divf %63, %64 : vector<2x128xf32>
    %66 = arith.select %10, %60, %65 : vector<2x128xi1>, vector<2x128xf32>
    %67 = vector.extract_strided_slice %66 {offsets = [0, 0], sizes = [2, 32], strides = [1, 1]} : vector<2x128xf32> to vector<2x32xf32>
    %68 = vector.extract_strided_slice %66 {offsets = [0, 32], sizes = [2, 32], strides = [1, 1]} : vector<2x128xf32> to vector<2x32xf32>
    %69 = vector.extract_strided_slice %66 {offsets = [0, 64], sizes = [2, 32], strides = [1, 1]} : vector<2x128xf32> to vector<2x32xf32>
    %70 = vector.extract_strided_slice %66 {offsets = [0, 96], sizes = [2, 32], strides = [1, 1]} : vector<2x128xf32> to vector<2x32xf32>
    %71 = arith.mulf %68, %52 : vector<2x32xf32>
    %72 = arith.mulf %67, %70 : vector<2x32xf32>
    %73 = arith.addf %71, %72 : vector<2x32xf32>
    %74 = math.tanh %73 : vector<2x32xf32>
    %75 = arith.mulf %69, %74 : vector<2x32xf32>
    %c3_i32 = arith.constant 3 : i32
    %c2_i32_23 = arith.constant 2 : i32
    %76 = arith.muli %c3_i32, %c2_i32_23 : i32
    %77 = arith.index_cast %76 : i32 to index
    %c0_24 = arith.constant 0 : index
    %78 = vector.load %arg7[%77, %c0_24] : memref<16x128xf32, #tpu.memory_space<vmem>>, vector<2x128xf32>
    %cst_25 = arith.constant dense<0.000000e+00> : vector<2x128xf32>
    %79 = tpu.matmul %75, %7, %cst_25 {dimension_numbers = #tpu.dot_dimension_numbers<[1], [0], [0], [1], [0, 0, 1, 1], [], []>} : vector<2x32xf32>, vector<32x128xf32>, vector<2x128xf32> -> vector<2x128xf32>
    %80 = arith.addf %78, %79 : vector<2x128xf32>
    %81 = math.tanh %80 : vector<2x128xf32>
    %82 = arith.negf %80 : vector<2x128xf32>
    %83 = math.exp %82 : vector<2x128xf32>
    %cst_26 = arith.constant 1.000000e+00 : f32
    %84 = vector.broadcast %cst_26 : f32 to vector<2x128xf32>
    %85 = arith.addf %84, %83 : vector<2x128xf32>
    %86 = arith.divf %84, %85 : vector<2x128xf32>
    %87 = arith.select %10, %81, %86 : vector<2x128xi1>, vector<2x128xf32>
    %88 = vector.extract_strided_slice %87 {offsets = [0, 0], sizes = [2, 32], strides = [1, 1]} : vector<2x128xf32> to vector<2x32xf32>
    %89 = vector.extract_strided_slice %87 {offsets = [0, 32], sizes = [2, 32], strides = [1, 1]} : vector<2x128xf32> to vector<2x32xf32>
    %90 = vector.extract_strided_slice %87 {offsets = [0, 64], sizes = [2, 32], strides = [1, 1]} : vector<2x128xf32> to vector<2x32xf32>
    %91 = vector.extract_strided_slice %87 {offsets = [0, 96], sizes = [2, 32], strides = [1, 1]} : vector<2x128xf32> to vector<2x32xf32>
    %92 = arith.mulf %89, %73 : vector<2x32xf32>
    %93 = arith.mulf %88, %91 : vector<2x32xf32>
    %94 = arith.addf %92, %93 : vector<2x32xf32>
    %95 = math.tanh %94 : vector<2x32xf32>
    %96 = arith.mulf %90, %95 : vector<2x32xf32>
    %c4_i32 = arith.constant 4 : i32
    %c2_i32_27 = arith.constant 2 : i32
    %97 = arith.muli %c4_i32, %c2_i32_27 : i32
    %98 = arith.index_cast %97 : i32 to index
    %c0_28 = arith.constant 0 : index
    %99 = vector.load %arg7[%98, %c0_28] : memref<16x128xf32, #tpu.memory_space<vmem>>, vector<2x128xf32>
    %cst_29 = arith.constant dense<0.000000e+00> : vector<2x128xf32>
    %100 = tpu.matmul %96, %7, %cst_29 {dimension_numbers = #tpu.dot_dimension_numbers<[1], [0], [0], [1], [0, 0, 1, 1], [], []>} : vector<2x32xf32>, vector<32x128xf32>, vector<2x128xf32> -> vector<2x128xf32>
    %101 = arith.addf %99, %100 : vector<2x128xf32>
    %102 = math.tanh %101 : vector<2x128xf32>
    %103 = arith.negf %101 : vector<2x128xf32>
    %104 = math.exp %103 : vector<2x128xf32>
    %cst_30 = arith.constant 1.000000e+00 : f32
    %105 = vector.broadcast %cst_30 : f32 to vector<2x128xf32>
    %106 = arith.addf %105, %104 : vector<2x128xf32>
    %107 = arith.divf %105, %106 : vector<2x128xf32>
    %108 = arith.select %10, %102, %107 : vector<2x128xi1>, vector<2x128xf32>
    %109 = vector.extract_strided_slice %108 {offsets = [0, 0], sizes = [2, 32], strides = [1, 1]} : vector<2x128xf32> to vector<2x32xf32>
    %110 = vector.extract_strided_slice %108 {offsets = [0, 32], sizes = [2, 32], strides = [1, 1]} : vector<2x128xf32> to vector<2x32xf32>
    %111 = vector.extract_strided_slice %108 {offsets = [0, 64], sizes = [2, 32], strides = [1, 1]} : vector<2x128xf32> to vector<2x32xf32>
    %112 = vector.extract_strided_slice %108 {offsets = [0, 96], sizes = [2, 32], strides = [1, 1]} : vector<2x128xf32> to vector<2x32xf32>
    %113 = arith.mulf %110, %94 : vector<2x32xf32>
    %114 = arith.mulf %109, %112 : vector<2x32xf32>
    %115 = arith.addf %113, %114 : vector<2x32xf32>
    %116 = math.tanh %115 : vector<2x32xf32>
    %117 = arith.mulf %111, %116 : vector<2x32xf32>
    %c5_i32 = arith.constant 5 : i32
    %c2_i32_31 = arith.constant 2 : i32
    %118 = arith.muli %c5_i32, %c2_i32_31 : i32
    %119 = arith.index_cast %118 : i32 to index
    %c0_32 = arith.constant 0 : index
    %120 = vector.load %arg7[%119, %c0_32] : memref<16x128xf32, #tpu.memory_space<vmem>>, vector<2x128xf32>
    %cst_33 = arith.constant dense<0.000000e+00> : vector<2x128xf32>
    %121 = tpu.matmul %117, %7, %cst_33 {dimension_numbers = #tpu.dot_dimension_numbers<[1], [0], [0], [1], [0, 0, 1, 1], [], []>} : vector<2x32xf32>, vector<32x128xf32>, vector<2x128xf32> -> vector<2x128xf32>
    %122 = arith.addf %120, %121 : vector<2x128xf32>
    %123 = math.tanh %122 : vector<2x128xf32>
    %124 = arith.negf %122 : vector<2x128xf32>
    %125 = math.exp %124 : vector<2x128xf32>
    %cst_34 = arith.constant 1.000000e+00 : f32
    %126 = vector.broadcast %cst_34 : f32 to vector<2x128xf32>
    %127 = arith.addf %126, %125 : vector<2x128xf32>
    %128 = arith.divf %126, %127 : vector<2x128xf32>
    %129 = arith.select %10, %123, %128 : vector<2x128xi1>, vector<2x128xf32>
    %130 = vector.extract_strided_slice %129 {offsets = [0, 0], sizes = [2, 32], strides = [1, 1]} : vector<2x128xf32> to vector<2x32xf32>
    %131 = vector.extract_strided_slice %129 {offsets = [0, 32], sizes = [2, 32], strides = [1, 1]} : vector<2x128xf32> to vector<2x32xf32>
    %132 = vector.extract_strided_slice %129 {offsets = [0, 64], sizes = [2, 32], strides = [1, 1]} : vector<2x128xf32> to vector<2x32xf32>
    %133 = vector.extract_strided_slice %129 {offsets = [0, 96], sizes = [2, 32], strides = [1, 1]} : vector<2x128xf32> to vector<2x32xf32>
    %134 = arith.mulf %131, %115 : vector<2x32xf32>
    %135 = arith.mulf %130, %133 : vector<2x32xf32>
    %136 = arith.addf %134, %135 : vector<2x32xf32>
    %137 = math.tanh %136 : vector<2x32xf32>
    %138 = arith.mulf %132, %137 : vector<2x32xf32>
    %c6_i32 = arith.constant 6 : i32
    %c2_i32_35 = arith.constant 2 : i32
    %139 = arith.muli %c6_i32, %c2_i32_35 : i32
    %140 = arith.index_cast %139 : i32 to index
    %c0_36 = arith.constant 0 : index
    %141 = vector.load %arg7[%140, %c0_36] : memref<16x128xf32, #tpu.memory_space<vmem>>, vector<2x128xf32>
    %cst_37 = arith.constant dense<0.000000e+00> : vector<2x128xf32>
    %142 = tpu.matmul %138, %7, %cst_37 {dimension_numbers = #tpu.dot_dimension_numbers<[1], [0], [0], [1], [0, 0, 1, 1], [], []>} : vector<2x32xf32>, vector<32x128xf32>, vector<2x128xf32> -> vector<2x128xf32>
    %143 = arith.addf %141, %142 : vector<2x128xf32>
    %144 = math.tanh %143 : vector<2x128xf32>
    %145 = arith.negf %143 : vector<2x128xf32>
    %146 = math.exp %145 : vector<2x128xf32>
    %cst_38 = arith.constant 1.000000e+00 : f32
    %147 = vector.broadcast %cst_38 : f32 to vector<2x128xf32>
    %148 = arith.addf %147, %146 : vector<2x128xf32>
    %149 = arith.divf %147, %148 : vector<2x128xf32>
    %150 = arith.select %10, %144, %149 : vector<2x128xi1>, vector<2x128xf32>
    %151 = vector.extract_strided_slice %150 {offsets = [0, 0], sizes = [2, 32], strides = [1, 1]} : vector<2x128xf32> to vector<2x32xf32>
    %152 = vector.extract_strided_slice %150 {offsets = [0, 32], sizes = [2, 32], strides = [1, 1]} : vector<2x128xf32> to vector<2x32xf32>
    %153 = vector.extract_strided_slice %150 {offsets = [0, 64], sizes = [2, 32], strides = [1, 1]} : vector<2x128xf32> to vector<2x32xf32>
    %154 = vector.extract_strided_slice %150 {offsets = [0, 96], sizes = [2, 32], strides = [1, 1]} : vector<2x128xf32> to vector<2x32xf32>
    %155 = arith.mulf %152, %136 : vector<2x32xf32>
    %156 = arith.mulf %151, %154 : vector<2x32xf32>
    %157 = arith.addf %155, %156 : vector<2x32xf32>
    %158 = math.tanh %157 : vector<2x32xf32>
    %159 = arith.mulf %153, %158 : vector<2x32xf32>
    %c7_i32 = arith.constant 7 : i32
    %c2_i32_39 = arith.constant 2 : i32
    %160 = arith.muli %c7_i32, %c2_i32_39 : i32
    %161 = arith.index_cast %160 : i32 to index
    %c0_40 = arith.constant 0 : index
    %162 = vector.load %arg7[%161, %c0_40] : memref<16x128xf32, #tpu.memory_space<vmem>>, vector<2x128xf32>
    %cst_41 = arith.constant dense<0.000000e+00> : vector<2x128xf32>
    %163 = tpu.matmul %159, %7, %cst_41 {dimension_numbers = #tpu.dot_dimension_numbers<[1], [0], [0], [1], [0, 0, 1, 1], [], []>} : vector<2x32xf32>, vector<32x128xf32>, vector<2x128xf32> -> vector<2x128xf32>
    %164 = arith.addf %162, %163 : vector<2x128xf32>
    %165 = math.tanh %164 : vector<2x128xf32>
    %166 = arith.negf %164 : vector<2x128xf32>
    %167 = math.exp %166 : vector<2x128xf32>
    %cst_42 = arith.constant 1.000000e+00 : f32
    %168 = vector.broadcast %cst_42 : f32 to vector<2x128xf32>
    %169 = arith.addf %168, %167 : vector<2x128xf32>
    %170 = arith.divf %168, %169 : vector<2x128xf32>
    %171 = arith.select %10, %165, %170 : vector<2x128xi1>, vector<2x128xf32>
    %172 = vector.extract_strided_slice %171 {offsets = [0, 0], sizes = [2, 32], strides = [1, 1]} : vector<2x128xf32> to vector<2x32xf32>
    %173 = vector.extract_strided_slice %171 {offsets = [0, 32], sizes = [2, 32], strides = [1, 1]} : vector<2x128xf32> to vector<2x32xf32>
    %174 = vector.extract_strided_slice %171 {offsets = [0, 64], sizes = [2, 32], strides = [1, 1]} : vector<2x128xf32> to vector<2x32xf32>
    %175 = vector.extract_strided_slice %171 {offsets = [0, 96], sizes = [2, 32], strides = [1, 1]} : vector<2x128xf32> to vector<2x32xf32>
    %176 = arith.mulf %173, %157 : vector<2x32xf32>
    %177 = arith.mulf %172, %175 : vector<2x32xf32>
    %178 = arith.addf %176, %177 : vector<2x32xf32>
    %179 = math.tanh %178 : vector<2x32xf32>
    %180 = arith.mulf %174, %179 : vector<2x32xf32>
    %c8_i32 = arith.constant 8 : i32
    %c0_43 = arith.constant 0 : index
    %c0_44 = arith.constant 0 : index
    %181 = vector.load %arg4[%c0_43, %c0_44] : memref<32x16xf32, #tpu.memory_space<vmem>>, vector<32x16xf32>
    %cst_45 = arith.constant dense<0.000000e+00> : vector<2x16xf32>
    %182 = tpu.matmul %180, %181, %cst_45 {dimension_numbers = #tpu.dot_dimension_numbers<[1], [0], [0], [1], [0, 0, 1, 1], [], []>} : vector<2x32xf32>, vector<32x16xf32>, vector<2x16xf32> -> vector<2x16xf32>
    %c0_46 = arith.constant 0 : index
    %c0_47 = arith.constant 0 : index
    %183 = vector.load %arg5[%c0_46, %c0_47] : memref<1x16xf32, #tpu.memory_space<vmem>>, vector<1x16xf32>
    %184 = vector.broadcast %183 : vector<1x16xf32> to vector<2x16xf32>
    %185 = arith.addf %182, %184 : vector<2x16xf32>
    %cst_48 = arith.constant 0.000000e+00 : f32
    %186 = vector.broadcast %cst_48 : f32 to vector<2x16xf32>
    %187 = arith.maximumf %185, %186 : vector<2x16xf32>
    %c0_49 = arith.constant 0 : index
    %c0_50 = arith.constant 0 : index
    %188 = vector.load %arg6[%c0_49, %c0_50] : memref<2x16xf32, #tpu.memory_space<vmem>>, vector<2x16xf32>
    tpu.vector_store %arg6[%c0_49, %c0_50], %187 {strides = array<i32>} : memref<2x16xf32, #tpu.memory_space<vmem>>, vector<2x16xf32>,
    return
  }
}

</mosaic_0001>

<bundles_post_ra>
// kernel: tpu_custom_call.1
= control target key start
LH: loop header
LB: loop body
LE: loop exit
PB: predicated region body
PF: predicated region fallthrough
CT: control target
= control target key end

     0   :  { %11 = vsyncpa [#allocation4], 0  ;;  %s1646_s0 = inlined_call_operand.vmem [shape: f32[16,32], index: 0, kind: input, shape index: {}]   ;;  %s1647_s1 = inlined_call_operand.vmem [shape: f32[32,128], index: 1, kind: input, shape index: {}]   ;;  %s1648_s2 = inlined_call_operand.hbm [shape: f32[32,128], index: 2, kind: input, shape index: {}]   ;;  %s1649_s3 = inlined_call_operand.vmem [shape: f32[1,128], index: 3, kind: input, shape index: {}]   ;;  %s1650_s4 = inlined_call_operand.vmem [shape: f32[32,16], index: 4, kind: input, shape index: {}]   ;;  %s1651_s5 = inlined_call_operand.vmem [shape: f32[1,16], index: 5, kind: input, shape index: {}]   ;;  %s1652_s6 = inlined_call_operand.hbm [shape: f32[2,16], index: 6, kind: output, shape index: {}]  }
   0x1   :  { %12 = vsyncpa [#allocation5], 0  ;;  %s1424_s21 = smov [#allocation3]   ;;  %s1376_s25 = scalar_lea.hbm %s1648_s2, 512 }
   0x2   :  { %s22_s22 = sshll.u32 %s1424_s21, 4  ;;  %p1377_p0 = scmp.ne.s32.totalorder %s1648_s2, %s1376_s25  ;;  %s23_s22 = int_to_ptr.vmem [resolvable:$true] %s22_s22 }
   0x3   :  { %p1380_p1 = scmp.lt.u32.totalorder %s1376_s25, %s1648_s2 }
   0x5   :  { %p1382_p2 = pnand %p1380_p1, %p1377_p0 }
   0x7   :  { %1385 = shalt.err (!%p1382_p2)
}
   0x8   :  { %s1386_s30 = scalar_lea.vmem %s23_s22, 512  ;;  %p1391_p4 = scmp.lt.s32.totalorder %s23_s22, %s23_s22 }
   0x9   :  { %p1387_p3 = scmp.ne.s32.totalorder %s23_s22, %s1386_s30  ;;  %p1392_p5 = scmp.lt.s32.totalorder %s1386_s30, %s1386_s30 }
   0xb   :  { %p1393_p6 = por %p1392_p5, %p1391_p4 }
   0xd   :  { %p1394_p7 = pnand %p1393_p6, %p1387_p3 }
   0xf   :  { %1397 = shalt.err (!%p1394_p7)
}
  0x10   :  { %s1425_s7 = smov 128   ;;  %s1426_s8 = smov 8  }
  0x11   :  { %28 = dma.hbm_to_vmem [thread:$0]  %s1648_s2, 512, %s23_s22, [#allocation4], %s1425_s7, %s1425_s7, %s1426_s8  }
  0x12   :  { %1420 = dma.done.wait [#allocation4], 512  }
  0x13   :  { %1421 = vsyncadd [#allocation4], 4294966784  ;;  %v1427_v0 = vmov 0.0|0.0   ;;  %vm1428_vm0 = vmmov 0   ;;  %v1429_v1 = vmov 0.0   ;;  %vm51_vm1 = vcmask 261120  }
  0x14   :  { %1249 = vmatprep.subr.bf16.mxu1 %v1427_v0  ;;  %1150 = vmatprep.mubr.msk.f32.mxu1 %vm1428_vm0, %v1429_v1  ;;  %v40_v2 = vld [vmem:[%s1647_s1] sm:$0xff]  ;;  %v41_v3 = vld [vmem:[%s1647_s1 + $0x8] sm:$0xff]  ;;  %v42_v4 = vld [vmem:[%s1647_s1 + $0x10] sm:$0xff]  ;;  %v139_v28 = vlaneseq  ;;  %s1431_s22 = smov 64   ;;  %vm1043_vm3 = vcmask 123904  }
  0x15   :  { %v1241_v5 = vpack.c.bf16 %v41_v3, %v40_v2  ;;  %v43_v6 = vld [vmem:[%s1647_s1 + $0x18] sm:$0xff]  ;;  %v38_v7 = vld [vmem:[%s1646_s0] sm:$0xff]  ;;  %v135_v9 = vld [vmem:[#allocation3] sm:$0xff] }
  0x16   :  { %v1245_v8 = vpack.c.bf16 %v43_v6, %v42_v4  ;;  %1139 = vmatprep.mubr.msk.f32.mxu0 %vm51_vm1, %v38_v7  ;;  %v136_v10 = vld [vmem:[#allocation3 + $0x8] sm:$0xff]  ;;  %v137_v11 = vld [vmem:[#allocation3 + $0x10] sm:$0xff]  ;;  %v138_v13 = vld [vmem:[#allocation3 + $0x18] sm:$0xff]  ;;  %v1528_v29 = vand.u32 127, %v139_v28 }
  0x17   :  { %1242 = vmatprep.subr.bf16.mxu0 %v1241_v5  ;;  %v1499_v12 = vpack.c.bf16 %v136_v10, %v135_v9  ;;  %v1502_v14 = vpack.c.bf16 %v138_v13, %v137_v11  ;;  %v39_v15 = vld [vmem:[%s1646_s0 + $0x8] sm:$0xff]  ;;  %v1060_v16 = vld [vmem:[%s1649_s3] ss:$0 sm:$0xff]  ;;  %s1430_s3 = smov 32  }
  0x18   :  { %1244 = vmatpush3.bf16.msra.mxu0 %v1241_v5  ;;  %vm141_vm2 = vcmp.ge.s32.totalorder %v1528_v29, 96  ;;  %v958_v29 = vld [vmem:[%s1650_s4 + $0x10] sm:$0xff] }
  0x19   :  { %1246 = vmatprep.subr.bf16.mxu0 %v1245_v8  ;;  %1251 = vmatpush3.bf16.msra.mxu1 %v1499_v12 }
  0x1a   :  { %1252 = vmatprep.subr.bf16.mxu1 %v1427_v0 }
  0x1c   :  { %1248 = vmatpush3.bf16.msra.mxu0 %v1245_v8 }
  0x1d   :  { %1254 = vmatpush3.bf16.msra.mxu1 %v1502_v14  ;;  %1255 = vmatprep.subr.bf16.mxu0 %v1427_v0 }
  0x1e   :  { %1261 = vmatprep.subr.bf16.mxu1 %v1427_v0 }
  0x1f   :  { %1140 = vmatmul.mubr.msk.f32.vlgmr.msra.gmra.mrb[0].mxu0 %vm51_vm1, %v39_v15 }
  0x20   :  { %1151 = vmatmul.mubr.f32.vlgmr.msra.gmra.mrb[0].mxu1 %v1429_v1  ;;  %1257 = vmatpush3.bf16.msra.mxu0 %v1499_v12 }
  0x21   :  { %1258 = vmatprep.subr.bf16.mxu0 %v1427_v0  ;;  %1161 = vmatprep.mubr.msk.f32.mxu0 %vm1428_vm0, %v1429_v1 }
  0x22   :  { %1263 = vmatpush3.bf16.msra.mxu1 %v1499_v12  ;;  %1172 = vmatprep.mubr.msk.f32.mxu1 %vm1428_vm0, %v1429_v1 }
  0x23   :  { %1264 = vmatprep.subr.bf16.mxu1 %v1427_v0 }
  0x24   :  { %1260 = vmatpush3.bf16.msra.mxu0 %v1502_v14 }
  0x25   :  { %1267 = vmatprep.subr.bf16.mxu0 %v1427_v0 }
  0x26   :  { %1266 = vmatpush3.bf16.msra.mxu1 %v1502_v14 }
  0x27   :  { %1273 = vmatprep.subr.bf16.mxu1 %v1427_v0 }
  0xf2   :  { %v1141_v17 = vpop.f32.mrb[0].mxu0 }
  0xf3   :  { %v130_v18 = vadd.f32 %v1141_v17, %v1060_v16  ;;  %v124_v19 = vpop.f32.mrb[1].mxu0  ;;  %v212_v20 = vpop.f32.mrb[0].mxu1 }
  0xf4   :  { %v125_v21 = vadd.f32 %v1060_v16, %v124_v19  ;;  %v1152_v22 = vpop.f32.mrb[1].mxu1 }
  0xf5   :  { %134 = vst [vmem:[#allocation2 + $0x8] sm:$0xff] %v130_v18 }
  0xf6   :  { %133 = vst [vmem:[#allocation2] sm:$0xff] %v125_v21 }
  0xfd   :  { %v142_v23 = vld [vmem:[#allocation2] sm:$0x3]  ;;  %v242_v42 = vld [vmem:[#allocation2 + $0x2] sm:$0x3]  ;;  %v344_v61 = vld [vmem:[#allocation2 + $0x4] sm:$0x3] }
  0xfe   :  { %v216_v24 = vadd.f32 %v212_v20, %v142_v23  ;;  %v446_v20 = vld [vmem:[#allocation2 + $0x6] sm:$0x3] }
 0x100   :  { %v1063_v25 = vmul.f32 -1.442695, %v216_v24 }
 0x102   :  { %1312 = vpow2.f32 %v1063_v25 }
 0x103   :  { %1314 = vtanh.f32 %v216_v24 }
 0x10c   :  { %v1313_v26 = vpop.eup %1312 }
 0x10d   :  { %v221_v27 = vadd.f32 1.0, %v1313_v26  ;;  %v1315_v30 = vpop.eup %1314 }
 0x10f   :  { %1316 = vrcp.f32 %v221_v27 }
 0x119   :  { %v1317_v31 = vpop.eup %1316 }
 0x11a   :  { %v224_v32 = vsel %vm141_vm2, %v1315_v30, %v1317_v31 }
 0x11b   :  { %227 = vrot.lane.b32.xlu0 %v224_v32, %s1430_s3  ;;  %v225_v35 = vmul.f32 0.0, %v224_v32 }
 0x18d   :  { %v228_v33 = vpop.permute.xlu0 %227 }
 0x18e   :  { %v230_v34 = vmul.f32 %v228_v33, %v224_v32 }
 0x190   :  { %232 = vrot.lane.b32.xlu0 %v230_v34, %s1430_s3 }
 0x202   :  { %v233_v36 = vpop.permute.xlu0 %232 }
 0x203   :  { %v235_v37 = vadd.f32 %v233_v36, %v225_v35 }
 0x205   :  { %1318 = vtanh.f32 %v235_v37 }
 0x20f   :  { %v1319_v38 = vpop.eup %1318 }
 0x210   :  { %238 = vrot.lane.b32.xlu1 %v1319_v38, %s1430_s3 }
 0x282   :  { %v239_v39 = vpop.permute.xlu1 %238 }
 0x283   :  { %v241_v40 = vmul.f32 %v239_v39, %v224_v32 }
 0x285   :  { %244 = vrot.lane.b32.xlu1 %v241_v40, %s1431_s22  ;;  %v548_v40 = vld [vmem:[#allocation2 + $0x8] sm:$0x3] }
 0x2f7   :  { %v245_v41 = vpop.permute.xlu1 %244 }
 0x2f8   :  { %1162 = vmatmul.mubr.msk.f32.vlgmr.msra.gmra.mrb[2].mxu0 %vm51_vm1, %v245_v41 }
 0x2f9   :  { %1269 = vmatpush3.bf16.msra.mxu0 %v1499_v12  ;;  %1183 = vmatprep.mubr.msk.f32.mxu0 %vm1428_vm0, %v1429_v1 }
 0x2fa   :  { %1270 = vmatprep.subr.bf16.mxu0 %v1427_v0 }
 0x2fd   :  { %1272 = vmatpush3.bf16.msra.mxu0 %v1502_v14 }
 0x2fe   :  { %1279 = vmatprep.subr.bf16.mxu0 %v1427_v0 }
 0x3cb   :  { %v314_v43 = vpop.f32.mrb[2].mxu0 }
 0x3cc   :  { %v318_v44 = vadd.f32 %v314_v43, %v242_v42  ;;  %v1163_v45 = vpop.f32.mrb[3].mxu0 }
 0x3ce   :  { %v1065_v46 = vmul.f32 -1.442695, %v318_v44 }
 0x3d0   :  { %1320 = vpow2.f32 %v1065_v46 }
 0x3d1   :  { %1322 = vtanh.f32 %v318_v44 }
 0x3da   :  { %v1321_v47 = vpop.eup %1320 }
 0x3db   :  { %v323_v48 = vadd.f32 1.0, %v1321_v47  ;;  %v1323_v49 = vpop.eup %1322 }
 0x3dd   :  { %1324 = vrcp.f32 %v323_v48 }
 0x3e7   :  { %v1325_v50 = vpop.eup %1324 }
 0x3e8   :  { %v326_v51 = vsel %vm141_vm2, %v1323_v49, %v1325_v50 }
 0x3e9   :  { %329 = vrot.lane.b32.xlu0 %v326_v51, %s1430_s3  ;;  %v327_v54 = vmul.f32 %v326_v51, %v235_v37 }
 0x45b   :  { %v330_v52 = vpop.permute.xlu0 %329 }
 0x45c   :  { %v332_v53 = vmul.f32 %v330_v52, %v326_v51 }
 0x45e   :  { %334 = vrot.lane.b32.xlu1 %v332_v53, %s1430_s3 }
 0x4d0   :  { %v335_v55 = vpop.permute.xlu1 %334 }
 0x4d1   :  { %v337_v56 = vadd.f32 %v335_v55, %v327_v54 }
 0x4d3   :  { %1326 = vtanh.f32 %v337_v56 }
 0x4dd   :  { %v1327_v57 = vpop.eup %1326 }
 0x4de   :  { %340 = vrot.lane.b32.xlu0 %v1327_v57, %s1430_s3 }
 0x550   :  { %v341_v58 = vpop.permute.xlu0 %340 }
 0x551   :  { %v343_v59 = vmul.f32 %v341_v58, %v326_v51 }
 0x553   :  { %346 = vrot.lane.b32.xlu1 %v343_v59, %s1431_s22  ;;  %v650_v59 = vld [vmem:[#allocation2 + $0xa] sm:$0x3] }
 0x5c5   :  { %v347_v60 = vpop.permute.xlu1 %346 }
 0x5c6   :  { %1173 = vmatmul.mubr.msk.f32.vlgmr.msra.gmra.mrb[2].mxu1 %vm51_vm1, %v347_v60 }
 0x5c7   :  { %1275 = vmatpush3.bf16.msra.mxu1 %v1499_v12  ;;  %1194 = vmatprep.mubr.msk.f32.mxu1 %vm1428_vm0, %v1429_v1 }
 0x5c8   :  { %1276 = vmatprep.subr.bf16.mxu1 %v1427_v0 }
 0x5cb   :  { %1278 = vmatpush3.bf16.msra.mxu1 %v1502_v14 }
 0x5cc   :  { %1285 = vmatprep.subr.bf16.mxu1 %v1427_v0 }
 0x699   :  { %v416_v62 = vpop.f32.mrb[2].mxu1 }
 0x69a   :  { %v420_v63 = vadd.f32 %v416_v62, %v344_v61  ;;  %v1174_v2 = vpop.f32.mrb[3].mxu1 }
 0x69c   :  { %v1067_v3 = vmul.f32 -1.442695, %v420_v63 }
 0x69e   :  { %1328 = vpow2.f32 %v1067_v3 }
 0x69f   :  { %1330 = vtanh.f32 %v420_v63 }
 0x6a8   :  { %v1329_v4 = vpop.eup %1328 }
 0x6a9   :  { %v425_v5 = vadd.f32 1.0, %v1329_v4  ;;  %v1331_v6 = vpop.eup %1330 }
 0x6ab   :  { %1332 = vrcp.f32 %v425_v5 }
 0x6b5   :  { %v1333_v7 = vpop.eup %1332 }
 0x6b6   :  { %v428_v8 = vsel %vm141_vm2, %v1331_v6, %v1333_v7 }
 0x6b7   :  { %431 = vrot.lane.b32.xlu0 %v428_v8, %s1430_s3  ;;  %v429_v11 = vmul.f32 %v428_v8, %v337_v56 }
 0x729   :  { %v432_v9 = vpop.permute.xlu0 %431 }
 0x72a   :  { %v434_v10 = vmul.f32 %v432_v9, %v428_v8 }
 0x72c   :  { %436 = vrot.lane.b32.xlu1 %v434_v10, %s1430_s3 }
 0x79e   :  { %v437_v13 = vpop.permute.xlu1 %436 }
 0x79f   :  { %v439_v15 = vadd.f32 %v437_v13, %v429_v11 }
 0x7a1   :  { %1334 = vtanh.f32 %v439_v15 }
 0x7ab   :  { %v1335_v16 = vpop.eup %1334 }
 0x7ac   :  { %442 = vrot.lane.b32.xlu0 %v1335_v16, %s1430_s3  ;;  %v752_v16 = vld [vmem:[#allocation2 + $0xc] sm:$0x3] }
 0x81e   :  { %v443_v17 = vpop.permute.xlu0 %442 }
 0x81f   :  { %v445_v18 = vmul.f32 %v443_v17, %v428_v8 }
 0x821   :  { %448 = vrot.lane.b32.xlu1 %v445_v18, %s1431_s22 }
 0x893   :  { %v449_v19 = vpop.permute.xlu1 %448 }
 0x894   :  { %1184 = vmatmul.mubr.msk.f32.vlgmr.msra.gmra.mrb[4].mxu0 %vm51_vm1, %v449_v19 }
 0x895   :  { %1281 = vmatpush3.bf16.msra.mxu0 %v1499_v12  ;;  %1205 = vmatprep.mubr.msk.f32.mxu0 %vm1428_vm0, %v1429_v1 }
 0x896   :  { %1282 = vmatprep.subr.bf16.mxu0 %v1427_v0 }
 0x899   :  { %1284 = vmatpush3.bf16.msra.mxu0 %v1502_v14 }
 0x89a   :  { %1291 = vmatprep.subr.bf16.mxu0 %v1427_v0 }
 0x967   :  { %v518_v21 = vpop.f32.mrb[4].mxu0 }
 0x968   :  { %v522_v22 = vadd.f32 %v518_v21, %v446_v20  ;;  %v1185_v23 = vpop.f32.mrb[5].mxu0 }
 0x96a   :  { %v1069_v24 = vmul.f32 -1.442695, %v522_v22 }
 0x96c   :  { %1336 = vpow2.f32 %v1069_v24 }
 0x96d   :  { %1338 = vtanh.f32 %v522_v22 }
 0x976   :  { %v1337_v25 = vpop.eup %1336 }
 0x977   :  { %v527_v26 = vadd.f32 1.0, %v1337_v25  ;;  %v1339_v27 = vpop.eup %1338 }
 0x979   :  { %1340 = vrcp.f32 %v527_v26 }
 0x983   :  { %v1341_v28 = vpop.eup %1340 }
 0x984   :  { %v530_v30 = vsel %vm141_vm2, %v1339_v27, %v1341_v28 }
 0x985   :  { %533 = vrot.lane.b32.xlu0 %v530_v30, %s1430_s3  ;;  %v531_v33 = vmul.f32 %v530_v30, %v439_v15 }
 0x9f7   :  { %v534_v31 = vpop.permute.xlu0 %533 }
 0x9f8   :  { %v536_v32 = vmul.f32 %v534_v31, %v530_v30 }
 0x9fa   :  { %538 = vrot.lane.b32.xlu1 %v536_v32, %s1430_s3 }
 0xa6c   :  { %v539_v34 = vpop.permute.xlu1 %538 }
 0xa6d   :  { %v541_v35 = vadd.f32 %v539_v34, %v531_v33 }
 0xa6f   :  { %1342 = vtanh.f32 %v541_v35 }
 0xa79   :  { %v1343_v36 = vpop.eup %1342 }
 0xa7a   :  { %544 = vrot.lane.b32.xlu0 %v1343_v36, %s1430_s3 }
 0xaec   :  { %v545_v37 = vpop.permute.xlu0 %544 }
 0xaed   :  { %v547_v38 = vmul.f32 %v545_v37, %v530_v30 }
 0xaef   :  { %550 = vrot.lane.b32.xlu1 %v547_v38, %s1431_s22 }
 0xb61   :  { %v551_v39 = vpop.permute.xlu1 %550 }
 0xb62   :  { %1195 = vmatmul.mubr.msk.f32.vlgmr.msra.gmra.mrb[4].mxu1 %vm51_vm1, %v551_v39 }
 0xb63   :  { %1287 = vmatpush3.bf16.msra.mxu1 %v1499_v12  ;;  %1216 = vmatprep.mubr.msk.f32.mxu1 %vm1428_vm0, %v1429_v1 }
 0xb64   :  { %1288 = vmatprep.subr.bf16.mxu1 %v1427_v0 }
 0xb67   :  { %1290 = vmatpush3.bf16.msra.mxu1 %v1502_v14 }
 0xb68   :  { %1297 = vmatprep.subr.bf16.mxu1 %v1427_v0 }
 0xc35   :  { %v620_v41 = vpop.f32.mrb[4].mxu1 }
 0xc36   :  { %v624_v42 = vadd.f32 %v620_v41, %v548_v40  ;;  %v1196_v43 = vpop.f32.mrb[5].mxu1 }
 0xc38   :  { %v1071_v44 = vmul.f32 -1.442695, %v624_v42 }
 0xc3a   :  { %1344 = vpow2.f32 %v1071_v44 }
 0xc3b   :  { %1346 = vtanh.f32 %v624_v42 }
 0xc44   :  { %v1345_v45 = vpop.eup %1344 }
 0xc45   :  { %v629_v46 = vadd.f32 1.0, %v1345_v45  ;;  %v1347_v47 = vpop.eup %1346 }
 0xc47   :  { %1348 = vrcp.f32 %v629_v46 }
 0xc51   :  { %v1349_v48 = vpop.eup %1348 }
 0xc52   :  { %v632_v49 = vsel %vm141_vm2, %v1347_v47, %v1349_v48 }
 0xc53   :  { %635 = vrot.lane.b32.xlu0 %v632_v49, %s1430_s3  ;;  %v633_v52 = vmul.f32 %v632_v49, %v541_v35  ;;  %v854_v35 = vld [vmem:[#allocation2 + $0xe] sm:$0x3] }
 0xcc5   :  { %v636_v50 = vpop.permute.xlu0 %635 }
 0xcc6   :  { %v638_v51 = vmul.f32 %v636_v50, %v632_v49  ;;  %v956_v50 = vld [vmem:[%s1650_s4] sm:$0xff] }
 0xcc8   :  { %640 = vrot.lane.b32.xlu1 %v638_v51, %s1430_s3  ;;  %v957_v51 = vld [vmem:[%s1650_s4 + $0x8] sm:$0xff] }
 0xd3a   :  { %v641_v53 = vpop.permute.xlu1 %640 }
 0xd3b   :  { %v643_v54 = vadd.f32 %v641_v53, %v633_v52  ;;  %v1298_v52 = vpack.c.bf16 %v957_v51, %v956_v50  ;;  %v959_v53 = vld [vmem:[%s1650_s4 + $0x18] sm:$0xff]  ;;  %s1432_s4 = smov [#allocation6]  }
 0xd3c   :  { %s1051_s9 = sshll.u32 %s1432_s4, 4  ;;  %s1052_s9 = int_to_ptr.vmem [resolvable:$true] %s1051_s9 }
 0xd3d   :  { %1350 = vtanh.f32 %v643_v54  ;;  %s1398_s10 = scalar_lea.vmem %s1052_s9, 32  ;;  %p1403_p9 = scmp.lt.s32.totalorder %s1052_s9, %s1052_s9 }
 0xd3e   :  { %p1399_p8 = scmp.ne.s32.totalorder %s1052_s9, %s1398_s10  ;;  %p1404_p10 = scmp.lt.s32.totalorder %s1398_s10, %s1398_s10 }
 0xd40   :  { %p1405_p11 = por %p1404_p10, %p1403_p9 }
 0xd42   :  { %p1406_p12 = pnand %p1405_p11, %p1399_p8 }
 0xd47   :  { %v1351_v55 = vpop.eup %1350 }
 0xd48   :  { %646 = vrot.lane.b32.xlu0 %v1351_v55, %s1430_s3 }
 0xdba   :  { %v647_v56 = vpop.permute.xlu0 %646 }
 0xdbb   :  { %v649_v57 = vmul.f32 %v647_v56, %v632_v49 }
 0xdbd   :  { %652 = vrot.lane.b32.xlu1 %v649_v57, %s1431_s22 }
 0xe2f   :  { %v653_v58 = vpop.permute.xlu1 %652 }
 0xe30   :  { %1206 = vmatmul.mubr.msk.f32.vlgmr.msra.gmra.mrb[6].mxu0 %vm51_vm1, %v653_v58 }
 0xe31   :  { %1293 = vmatpush3.bf16.msra.mxu0 %v1499_v12  ;;  %1227 = vmatprep.mubr.msk.f32.mxu0 %vm1428_vm0, %v1429_v1 }
 0xe32   :  { %1294 = vmatprep.subr.bf16.mxu0 %v1427_v0 }
 0xe35   :  { %1296 = vmatpush3.bf16.msra.mxu0 %v1502_v14 }
 0xf03   :  { %v722_v60 = vpop.f32.mrb[6].mxu0 }
 0xf04   :  { %v726_v61 = vadd.f32 %v722_v60, %v650_v59  ;;  %v1207_v62 = vpop.f32.mrb[7].mxu0  ;;  %v1078_v59 = vld [vmem:[%s1651_s5] ss:$0 sm:$0xff] }
 0xf06   :  { %v1073_v63 = vmul.f32 -1.442695, %v726_v61 }
 0xf08   :  { %1352 = vpow2.f32 %v1073_v63 }
 0xf09   :  { %1354 = vtanh.f32 %v726_v61 }
 0xf12   :  { %v1353_v2 = vpop.eup %1352 }
 0xf13   :  { %v731_v3 = vadd.f32 1.0, %v1353_v2  ;;  %v1355_v4 = vpop.eup %1354 }
 0xf15   :  { %1356 = vrcp.f32 %v731_v3 }
 0xf1f   :  { %v1357_v5 = vpop.eup %1356 }
 0xf20   :  { %v734_v12 = vsel %vm141_vm2, %v1355_v4, %v1357_v5 }
 0xf21   :  { %737 = vrot.lane.b32.xlu0 %v734_v12, %s1430_s3  ;;  %v735_v14 = vmul.f32 %v734_v12, %v643_v54  ;;  %v1301_v54 = vpack.c.bf16 %v959_v53, %v958_v29 }
 0xf93   :  { %v738_v6 = vpop.permute.xlu0 %737 }
 0xf94   :  { %v740_v7 = vmul.f32 %v738_v6, %v734_v12 }
 0xf96   :  { %742 = vrot.lane.b32.xlu1 %v740_v7, %s1430_s3 }
0x1008   :  { %v743_v8 = vpop.permute.xlu1 %742 }
0x1009   :  { %v745_v9 = vadd.f32 %v743_v8, %v735_v14 }
0x100b   :  { %1358 = vtanh.f32 %v745_v9 }
0x1015   :  { %v1359_v10 = vpop.eup %1358 }
0x1016   :  { %748 = vrot.lane.b32.xlu0 %v1359_v10, %s1430_s3 }
0x1088   :  { %v749_v11 = vpop.permute.xlu0 %748 }
0x1089   :  { %v751_v13 = vmul.f32 %v749_v11, %v734_v12 }
0x108b   :  { %754 = vrot.lane.b32.xlu1 %v751_v13, %s1431_s22 }
0x10fd   :  { %v755_v15 = vpop.permute.xlu1 %754 }
0x10fe   :  { %1217 = vmatmul.mubr.msk.f32.vlgmr.msra.gmra.mrb[6].mxu1 %vm51_vm1, %v755_v15 }
0x10ff   :  { %1238 = vmatprep.mubr.msk.f32.mxu1 %vm1428_vm0, %v1429_v1  ;;  %1299 = vmatpush3.bf16.msra.mxu1 %v1298_v52 }
0x1100   :  { %1300 = vmatprep.subr.bf16.mxu1 %v1427_v0 }
0x1103   :  { %1302 = vmatpush3.bf16.msra.mxu1 %v1301_v54 }
0x11d1   :  { %v824_v17 = vpop.f32.mrb[6].mxu1 }
0x11d2   :  { %v828_v18 = vadd.f32 %v824_v17, %v752_v16  ;;  %v1218_v19 = vpop.f32.mrb[7].mxu1 }
0x11d4   :  { %v1075_v20 = vmul.f32 -1.442695, %v828_v18 }
0x11d6   :  { %1360 = vpow2.f32 %v1075_v20 }
0x11d7   :  { %1362 = vtanh.f32 %v828_v18 }
0x11e0   :  { %v1361_v21 = vpop.eup %1360 }
0x11e1   :  { %v833_v22 = vadd.f32 1.0, %v1361_v21  ;;  %v1363_v23 = vpop.eup %1362 }
0x11e3   :  { %1364 = vrcp.f32 %v833_v22 }
0x11ed   :  { %v1365_v24 = vpop.eup %1364 }
0x11ee   :  { %v836_v25 = vsel %vm141_vm2, %v1363_v23, %v1365_v24 }
0x11ef   :  { %839 = vrot.lane.b32.xlu0 %v836_v25, %s1430_s3  ;;  %v837_v1 = vmul.f32 %v836_v25, %v745_v9 }
0x1261   :  { %v840_v26 = vpop.permute.xlu0 %839 }
0x1262   :  { %v842_v27 = vmul.f32 %v840_v26, %v836_v25 }
0x1264   :  { %844 = vrot.lane.b32.xlu1 %v842_v27, %s1430_s3 }
0x12d6   :  { %v845_v28 = vpop.permute.xlu1 %844 }
0x12d7   :  { %v847_v30 = vadd.f32 %v845_v28, %v837_v1 }
0x12d9   :  { %1366 = vtanh.f32 %v847_v30 }
0x12e3   :  { %v1367_v31 = vpop.eup %1366 }
0x12e4   :  { %850 = vrot.lane.b32.xlu0 %v1367_v31, %s1430_s3 }
0x1356   :  { %v851_v32 = vpop.permute.xlu0 %850 }
0x1357   :  { %v853_v33 = vmul.f32 %v851_v32, %v836_v25 }
0x1359   :  { %856 = vrot.lane.b32.xlu1 %v853_v33, %s1431_s22 }
0x13cb   :  { %v857_v34 = vpop.permute.xlu1 %856 }
0x13cc   :  { %1228 = vmatmul.mubr.msk.f32.vlgmr.msra.gmra.mrb[8].mxu0 %vm51_vm1, %v857_v34 }
0x149f   :  { %v926_v36 = vpop.f32.mrb[8].mxu0 }
0x14a0   :  { %v930_v37 = vadd.f32 %v926_v36, %v854_v35  ;;  %v1229_v38 = vpop.f32.mrb[9].mxu0 }
0x14a2   :  { %v1077_v39 = vmul.f32 -1.442695, %v930_v37 }
0x14a4   :  { %1368 = vpow2.f32 %v1077_v39 }
0x14a5   :  { %1370 = vtanh.f32 %v930_v37 }
0x14ae   :  { %v1369_v40 = vpop.eup %1368 }
0x14af   :  { %v935_v41 = vadd.f32 1.0, %v1369_v40  ;;  %v1371_v42 = vpop.eup %1370 }
0x14b1   :  { %1372 = vrcp.f32 %v935_v41 }
0x14bb   :  { %v1373_v43 = vpop.eup %1372 }
0x14bc   :  { %v938_v44 = vsel %vm141_vm2, %v1371_v42, %v1373_v43 }
0x14bd   :  { %941 = vrot.lane.b32.xlu0 %v938_v44, %s1430_s3  ;;  %v939_v47 = vmul.f32 %v938_v44, %v847_v30 }
0x152f   :  { %v942_v45 = vpop.permute.xlu0 %941 }
0x1530   :  { %v944_v46 = vmul.f32 %v942_v45, %v938_v44 }
0x1532   :  { %946 = vrot.lane.b32.xlu1 %v944_v46, %s1430_s3 }
0x15a4   :  { %v947_v48 = vpop.permute.xlu1 %946 }
0x15a5   :  { %v949_v49 = vadd.f32 %v947_v48, %v939_v47 }
0x15a7   :  { %1374 = vtanh.f32 %v949_v49 }
0x15b1   :  { %v1375_v55 = vpop.eup %1374 }
0x15b2   :  { %952 = vrot.lane.b32.xlu0 %v1375_v55, %s1430_s3 }
0x1624   :  { %v953_v56 = vpop.permute.xlu0 %952 }
0x1625   :  { %v955_v57 = vmul.f32 %v953_v56, %v938_v44 }
0x1627   :  { %968 = vrot.lane.b32.xlu1 %v955_v57, %s1431_s22 }
0x1699   :  { %v969_v58 = vpop.permute.xlu1 %968 }
0x169a   :  { %1239 = vmatmul.mubr.msk.f32.vlgmr.msra.gmra.mrb[8].mxu1 %vm51_vm1, %v969_v58 }
0x176d   :  { %v1038_v60 = vpop.f32.mrb[8].mxu1 }
0x176e   :  { %v1039_v61 = vadd.f32 %v1078_v59, %v1038_v60  ;;  %v1240_v0 = vpop.f32.mrb[9].mxu1 }
0x1770   :  { %v1042_v62 = vmax.f32 %v1039_v61, 0.0 }
0x1772   :  { %1044 = vst.msk [vmem:[#allocation6] sm:$0x3] %vm1043_vm3, %v1042_v62 }
0x1773   :  { %1409 = shalt.err (!%p1406_p12)
}
0x1774   :  { %s1410_s5 = scalar_lea.hbm %s1652_s6, 32 }
0x1775   :  { %p1411_p13 = scmp.ne.s32.totalorder %s1652_s6, %s1410_s5  ;;  %p1414_p0 = scmp.lt.u32.totalorder %s1410_s5, %s1652_s6 }
0x1777   :  { %p1416_p1 = pnand %p1414_p0, %p1411_p13 }
0x1779   :  { %1419 = shalt.err (!%p1416_p1)
}
0x177a   :  { %1054 = dma.vmem_to_hbm [thread:$0]  %s1052_s9, 32, %s1652_s6, [#allocation5]  }
0x177b   :  { %1422 = dma.done.wait [#allocation5], 32  }
0x177c   :  { %1423 = vsyncadd [#allocation5], 4294967264 }
0x177d   :  { %1058 = vsyncpa [#allocation4], 1 }
0x177e   :  { %1059 = vsyncpa [#allocation5], 1 }

</bundles_post_ra>
